<compile_context>
chip_gen: v6e
topology: v6e:2x2x1
jax: 0.10.0
libtpu: 0.0.40
codegen_flags: <defaults>
</compile_context>

<pallas_src>
import jax
import jax.numpy as jnp
from jax.experimental import pallas as pl
from jax.experimental.pallas import tpu as pltpu


_LANE = 128
_TARGET_HALF_BYTES = 2 << 20     # ~2 MiB per (Cp, Tt) channel-half block
_VMEM_CAP_BYTES = 40 << 20       # stay well under v7x's 64 MiB physical VMEM


def _gate_kernel(x_ref, o_ref):
    # x_ref: [Bb, 2, Cp, Tt]  (axis 1: 0 = sigmoid half, 1 = tanh half)
    # o_ref: [Bb, Cp, Tt]
    x = x_ref[...]
    a = x[:, 0]
    b = x[:, 1]
    # sigmoid(a) == 0.5 * (tanh(0.5*a) + 1): two tanh EUP pushes per element
    # instead of exp + reciprocal + tanh; the mul/add go to idle VALU slots.
    sig = 0.5 * (jnp.tanh(0.5 * a) + 1.0)
    o_ref[...] = (sig * jnp.tanh(b)).astype(o_ref.dtype)


def tanh_gate(value):
    """value: [B, C, T] (PyTorch NCW).  Returns [B, C // 2, T]."""
    B, C, T = value.shape
    assert C % 2 == 0, "channel dim must be even for the tanh gate"
    piv = C // 2
    dtype = value.dtype
    itemsize = jnp.dtype(dtype).itemsize

    # Free view reshape: the channel split is contiguous in NCW layout.
    x = value.reshape(B, 2, piv, T)

    # Sublane packing multiple for this dtype (f32: 8, bf16: 16, int8/fp8: 32).
    sub = max(8, 32 // itemsize)

    # --- Channel tile: full piv unless even a single 128-wide time tile would
    #     blow the per-half budget (very large piv); then tile channels rather
    #     than shrinking Tt below one lane tile. ---
    if piv * _LANE * itemsize > _TARGET_HALF_BYTES:
        Cp = max(sub, (_TARGET_HALF_BYTES // (_LANE * itemsize)) // sub * sub)
    else:
        Cp = piv                                  # full extent: legal for any piv
    grid_c = pl.cdiv(piv, Cp)

    # --- Time tile: biggest multiple of 128 near the byte budget; full-extent T
    #     if that already fits (full-extent blocks are always legal). ---
    tt = (_TARGET_HALF_BYTES // (Cp * itemsize)) // _LANE * _LANE
    tt = max(_LANE, tt)
    Tt = T if tt >= T else tt
    grid_t = pl.cdiv(T, Tt)

    # --- Batch blocking: only when the whole (piv, T) slab fits one small block;
    #     amortizes per-step overhead but keeps >=2 grid steps when B >= 2 so a
    #     v7x megacore still gets both TensorCores busy. ---
    Bb = 1
    if grid_c == 1 and grid_t == 1 and B > 1:
        half_bytes = Cp * Tt * itemsize
        Bb = int(max(1, _TARGET_HALF_BYTES // max(half_bytes, 1)))
        Bb = min(Bb, max(1, B // 2))
    grid_b = pl.cdiv(B, Bb)

    grid = (grid_b, grid_c, grid_t)

    # VMEM: (2 input halves + 1 output half) per buffer, double-buffered, plus
    # headroom for compiler-internal scratch; capped for v7x.
    buf_bytes = 3 * Bb * Cp * Tt * itemsize
    vmem_limit = int(min(max(2 * buf_bytes + (8 << 20), 16 << 20), _VMEM_CAP_BYTES))

    cost = pl.CostEstimate(
        flops=3 * B * piv * T,                  # gate multiply + sigmoid-as-tanh mul/add
        transcendentals=2 * B * piv * T,        # two tanh per output element
        bytes_accessed=(B * C * T + B * piv * T) * itemsize,
    )

    return pl.pallas_call(
        _gate_kernel,
        out_shape=jax.ShapeDtypeStruct((B, piv, T), dtype),
        grid=grid,
        in_specs=[pl.BlockSpec((Bb, 2, Cp, Tt), lambda b, c, t: (b, 0, c, t))],
        out_specs=pl.BlockSpec((Bb, Cp, Tt), lambda b, c, t: (b, c, t)),
        compiler_params=pltpu.CompilerParams(
            dimension_semantics=("parallel", "parallel", "parallel"),
            vmem_limit_bytes=vmem_limit),
        cost_estimate=cost,
    )(x)


def reference(value):
    """Pure-JAX reference (same math as the PyTorch forward)."""
    piv = value.shape[1] // 2
    return jax.nn.sigmoid(value[:, :piv, :]) * jnp.tanh(value[:, piv:, :])


if __name__ == "__main__":
    key = jax.random.PRNGKey(0)
    k1, k2, k3 = jax.random.split(key, 3)

    # Case 1: sublane/lane-aligned shape [B, C, T] = [2, 16, 256] (piv=8).
    x1 = jax.random.normal(k1, (2, 16, 256), jnp.float32)
    y1 = tanh_gate(x1)
    jax.block_until_ready(y1)
    assert y1.shape == (2, 8, 256)
    assert jnp.allclose(y1, reference(x1), atol=1e-5, rtol=1e-5), "mismatch (case 1)"

    # Case 2: awkward shape — odd piv=3, T not a multiple of 128.
    x2 = jax.random.normal(k2, (2, 6, 48), jnp.float32)
    y2 = tanh_gate(x2)
    jax.block_until_ready(y2)
    assert y2.shape == (2, 3, 48)
    assert jnp.allclose(y2, reference(x2), atol=1e-5, rtol=1e-5), "mismatch (case 2)"

    # Case 3: bf16, exercises the batch-blocked path (whole (piv, T) slab per step).
    x3 = jax.random.normal(k3, (4, 8, 64), jnp.float32).astype(jnp.bfloat16)
    y3 = tanh_gate(x3)
    jax.block_until_ready(y3)
    assert y3.shape == (4, 4, 64)
    assert jnp.allclose(y3.astype(jnp.float32), reference(x3).astype(jnp.float32),
                        atol=5e-2, rtol=5e-2), "mismatch (case 3)"

    print("KERNEL_OK")
</pallas_src>

<mosaic_0001>
module attributes {stable_mosaic.version = 11 : i64} {
  func.func @_gate_kernel(%arg0: i32, %arg1: i32, %arg2: i32, %arg3: memref<1x2x8x256xf32, #tpu.memory_space<vmem>>, %arg4: memref<1x8x256xf32, #tpu.memory_space<vmem>>) attributes {dimension_semantics = [#tpu.dimension_semantics<parallel>, #tpu.dimension_semantics<parallel>, #tpu.dimension_semantics<parallel>], iteration_bounds = array<i64: 2, 1, 1>, scalar_prefetch = 0 : i64, scratch_operands = 0 : i64, tpu.core_type = #tpu.core_type<tc>, window_params = [{transform_indices = @transform_0, window_bounds = array<i64: 1, 2, 8, 256>}, {transform_indices = @transform_1, window_bounds = array<i64: 1, 8, 256>}]} {
    %c0 = arith.constant 0 : index
    %c0_0 = arith.constant 0 : index
    %c0_1 = arith.constant 0 : index
    %c0_2 = arith.constant 0 : index
    %0 = vector.load %arg3[%c0, %c0_0, %c0_1, %c0_2] : memref<1x2x8x256xf32, #tpu.memory_space<vmem>>, vector<1x2x8x256xf32>
    %1 = vector.extract_strided_slice %0 {offsets = [0, 0, 0, 0], sizes = [1, 1, 8, 256], strides = [1, 1, 1, 1]} : vector<1x2x8x256xf32> to vector<1x1x8x256xf32>
    %2 = vector.shape_cast %1 : vector<1x1x8x256xf32> to vector<1x8x256xf32>
    %3 = vector.extract_strided_slice %0 {offsets = [0, 1, 0, 0], sizes = [1, 1, 8, 256], strides = [1, 1, 1, 1]} : vector<1x2x8x256xf32> to vector<1x1x8x256xf32>
    %4 = vector.shape_cast %3 : vector<1x1x8x256xf32> to vector<1x8x256xf32>
    %cst = arith.constant 5.000000e-01 : f32
    %5 = vector.broadcast %cst : f32 to vector<1x8x256xf32>
    %6 = arith.mulf %5, %2 : vector<1x8x256xf32>
    %7 = math.tanh %6 : vector<1x8x256xf32>
    %cst_3 = arith.constant 1.000000e+00 : f32
    %8 = vector.broadcast %cst_3 : f32 to vector<1x8x256xf32>
    %9 = arith.addf %7, %8 : vector<1x8x256xf32>
    %cst_4 = arith.constant 5.000000e-01 : f32
    %10 = vector.broadcast %cst_4 : f32 to vector<1x8x256xf32>
    %11 = arith.mulf %10, %9 : vector<1x8x256xf32>
    %12 = math.tanh %4 : vector<1x8x256xf32>
    %13 = arith.mulf %11, %12 : vector<1x8x256xf32>
    %c0_5 = arith.constant 0 : index
    %c0_6 = arith.constant 0 : index
    %c0_7 = arith.constant 0 : index
    %14 = vector.load %arg4[%c0_5, %c0_6, %c0_7] : memref<1x8x256xf32, #tpu.memory_space<vmem>>, vector<1x8x256xf32>
    tpu.vector_store %arg4[%c0_5, %c0_6, %c0_7], %13 {strides = array<i32>} : memref<1x8x256xf32, #tpu.memory_space<vmem>>, vector<1x8x256xf32>,
    return
  }
  func.func @transform_0(%arg0: i32, %arg1: i32, %arg2: i32) -> (i32, i32, i32, i32) {
    %c0_i32 = arith.constant 0 : i32
    %c0_i32_0 = arith.constant 0 : i32
    return %arg0, %c0_i32, %arg1, %arg2 : i32, i32, i32, i32
  }
  func.func @transform_1(%arg0: i32, %arg1: i32, %arg2: i32) -> (i32, i32, i32) {
    %c0_i32 = arith.constant 0 : i32
    return %arg0, %arg1, %arg2 : i32, i32, i32
  }
}

</mosaic_0001>

<bundles_post_ra>
// kernel: tpu_custom_call.1
= control target key start
LH: loop header
LB: loop body
LE: loop exit
PB: predicated region body
PF: predicated region fallthrough
CT: control target
= control target key end

     0   :  { %6 = vsyncpa [#allocation3], 0  ;;  %s648_s0 = inlined_call_operand.hbm [shape: f32[2,2,8,256], index: 0, kind: input, shape index: {}]   ;;  %s649_s1 = inlined_call_operand.hbm [shape: f32[2,8,256], index: 1, kind: output, shape index: {}]  }
   0x1   :  { %8 = vsyncpa [#allocation3 + $0x1], 0 }
   0x2   :  { %9 = vsyncpa [#allocation4], 0 }
   0x3   :  { %11 = vsyncpa [#allocation4 + $0x1], 0  ;;  %s509_s6 = smov 0   ;;  %s511_s7 = smov 0  }
   0x4   :  { %s513_s8 = smov 0   ;;  %s515_s9 = smov 0  }
   0x5   :  { %s517_s10 = smov 0   ;;  %s519_s11 = smov 0  }
   0x6 LB: > { %s296_s12 = sadd.s32 4294967295, %s493_s11   ;;  %s297_s13 = sadd.s32 4294967294, %s493_s11   ;;  %s493_s11 = sphi %s519_s11, %s17_s11   ;;  %s489_s10 = sphi %s517_s10, %s660_s10   ;;  %s485_s9 = sphi %s515_s9, %s659_s9   ;;  %s481_s8 = sphi %s513_s8, %s658_s8   ;;  %s477_s7 = sphi %s511_s7, %s657_s7   ;;  %s473_s6 = sphi %s509_s6, %s656_s6  }
   0x7   : > { %s36_s14 = sadd.s32 1, %s489_s10  ;;  %s47_s15 = sadd.s32 1, %s481_s8 }
   0x8   : > { %p38_p0 = scmp.ge.s32.totalorder %s36_s14, 2  ;;  %p54_p1 = scmp.ne.s32.totalorder %s481_s8, %s477_s7 }
   0x9   : > { %p55_p2 = scmp.eq.s32.totalorder %s493_s11, 0  ;;  %p60_p3 = scmp.ne.s32.totalorder %s477_s7, %s473_s6 }
   0xa   : > { %s662_s14 = smov (%p38_p0, %s36_s14), 0  ;;  %p61_p5 = scmp.eq.s32.totalorder %s296_s12, 0 }
   0xb   : > { %p550_p4 = por %p55_p2, %p54_p1  ;;  %s40_s17 = ssub.s32 %s489_s10, %s662_s14 }
   0xc   : > { %p88_p6 = scmp.eq.s32.totalorder %s296_s12, 1  ;;  %p45_p7 = scmp.eq.s32.totalorder %s40_s17, 0 }
   0xd   : > { %p556_p8 = por %p61_p5, %p60_p3  ;;  %p94_p10 = scmp.eq.s32.totalorder %s297_s13, 1 }
   0xe   : > { %p560_p9 = por %p88_p6, %p54_p1  ;;  %p325_p13 = scmp.lt.s32.totalorder %s493_s11, 2 }
   0xf   : > { %s565_s20 = scalar_select %p45_p7, %s481_s8, %s47_s15  }
  0x10   : > { %p567_p11 = por %p94_p10, %p60_p3  ;;  %s114_s22 = sand.u32 1, %s481_s8  }
  0x11   : > { %s300_s23 = sshll.u32 %s114_s22, 5  ;;  %s311_s24 = sshll.u32 %s489_s10, 9 }
  0x12   : > { %s128_s27 = scalar_lea.hbm %s648_s0, %s311_s24  ;;  %s118_s28 = scalar_lea.vmem [#allocation2], %s300_s23 }
  0x13   : > { %s129_s29 = sshll.u32 %s118_s28, 4  ;;  %p580_p0 = pnand %p325_p13, %p550_p4  ;;  %s130_s29 = int_to_ptr.vmem [resolvable:$true] %s129_s29 }
  0x14   : > { %p303_p1 = scmp.ge.s32.totalorder %s493_s11, 1  ;;  %s115_s2 = scalar_lea.sflag [#allocation3], %s114_s22 }
  0x15   : > { %p387_p2 = pneg %p580_p0  ;;  %s398_s3 = scalar_lea.vmem %s130_s29, 512 }
  0x16   : > { %p399_p3 = scmp.ne.s32.totalorder %s130_s29, %s398_s3  ;;  %s495_s4 = smov [#allocation2]  }
  0x17   : > { %s403_s5 = sshll.u32 %s495_s4, 4  ;;  %s404_s5 = int_to_ptr.vmem [resolvable:$false] %s403_s5 }
  0x18   : > { %p401_p5 = pnand %p399_p3, %p387_p2  ;;  %s405_s12 = scalar_lea.vmem %s404_s5, 1024 }
  0x19   : > { %p406_p7 = scmp.lt.s32.totalorder %s130_s29, %s404_s5  ;;  %p407_p10 = scmp.lt.s32.totalorder %s405_s12, %s398_s3 }
  0x1a   : > { %p402_p6 = pneg %p401_p5 }
  0x1b   : > { %p408_p12 = por %p407_p10, %p406_p7 }
  0x1d   : > { %p409_p4 = pnand %p408_p12, %p402_p6 }
  0x1f   : > { %412 = shalt.err (!%p409_p4)
}
  0x20   : > { %s496_s13 = smov 256   ;;  %s497_s15 = smov 16  }
  0x21   : > { %320 = dma.hbm_to_vmem [thread:$0]  (!%p580_p0), %s128_s27, 512, %s130_s29, %s115_s2, %s496_s13, %s496_s13, %s497_s15  }
  0x22   : > { %p137_p13 = scmp.lt.s32.totalorder %s493_s11, 3 }
  0x24   : > { %p138_p2 = pnand %p303_p1, %p137_p13 }
  0x25   : > { %s593_s16 = sand.u32 (!%p138_p2), 1, %s477_s7  }
  0x26   : > { %141 = sbr.rel (%p138_p2) target bundleno = 81 (0x51), region = 24  ;;  %s304_s17 = sshll.u32 (!%p138_p2), %s593_s16, 5 }
  0x27   : > { %s144_s22 = scalar_lea.sflag (!%p138_p2), [#allocation3], %s593_s16  ;;  %s147_s23 = scalar_lea.vmem (!%p138_p2), [#allocation2], %s304_s17 }
  0x2b   : > { %464 = dma.done.wait (%p556_p8), %s144_s22, 512  }
  0x2c   : > { %466 = vsyncadd (%p556_p8), %s144_s22, 4294966784  ;;  %v168_v0 = vld [vmem:[%s147_s23] sm:$0xff]  ;;  %v169_v1 = vld [vmem:[%s147_s23 + $0x8] sm:$0xff]  ;;  %s305_s24 = sshll.u32 %s593_s16, 4  ;;  %s312_s26 = sshll.u32 %s485_s9, 8 }
  0x2d   : > { %v172_v2 = vmul.f32 0.5, %v168_v0  ;;  %v173_v3 = vmul.f32 0.5, %v169_v1  ;;  %v170_v4 = vld [vmem:[%s147_s23 + $0x10] sm:$0xff]  ;;  %v171_v5 = vld [vmem:[%s147_s23 + $0x18] sm:$0xff]  ;;  %s165_s18 = scalar_lea.vmem [#allocation5], %s305_s24  ;;  %s203_s29 = scalar_lea.hbm %s649_s1, %s312_s26 }
  0x2e   : > { %s205_s25 = sshll.u32 %s165_s18, 4  ;;  %s187_s30 = scalar_lea.sflag [#allocation4], %s593_s16  ;;  %s603_s25 = int_to_ptr.vmem [resolvable:$true] %s205_s25 }
  0x2f   : > { %377 = vtanh.f32 %v172_v2  ;;  %s413_s2 = scalar_lea.vmem %s603_s25, 256  ;;  %s498_s9 = smov [#allocation5]  }
  0x30   : > { %379 = vtanh.f32 %v173_v3  ;;  %p414_p8 = scmp.ne.s32.totalorder %s603_s25, %s413_s2  ;;  %s417_s3 = sshll.u32 %s498_s9, 4  ;;  %s418_s3 = int_to_ptr.vmem [resolvable:$false] %s417_s3 }
  0x31   : > { %381 = vtanh.f32 %v170_v4  ;;  %s419_s4 = scalar_lea.vmem %s418_s3, 512  ;;  %p420_p1 = scmp.lt.s32.totalorder %s603_s25, %s418_s3 }
  0x32   : > { %383 = vtanh.f32 %v171_v5  ;;  %p415_p12 = pnand %p414_p8, %p560_p9  ;;  %p421_p3 = scmp.lt.s32.totalorder %s419_s4, %s413_s2 }
  0x34   : > { %p416_p0 = pneg %p415_p12  ;;  %p422_p5 = por %p421_p3, %p420_p1 }
  0x36   : > { %p423_p6 = pnand %p422_p5, %p416_p0 }
  0x3c   : > { %v378_v6 = vpop.eup %377 }
  0x3d   : > { %v380_v7 = vpop.eup %379  ;;  %v176_v8 = vadd.f32 1.0, %v378_v6 }
  0x3e   : > { %v382_v9 = vpop.eup %381  ;;  %v177_v10 = vadd.f32 1.0, %v380_v7 }
  0x3f   : > { %v384_v11 = vpop.eup %383  ;;  %v178_v12 = vmul.f32 0.5, %v176_v8 }
  0x40   : > { %v179_v13 = vmul.f32 0.5, %v177_v10 }
  0x41   : > { %v182_v14 = vmul.f32 %v382_v9, %v178_v12 }
  0x42   : > { %v183_v15 = vmul.f32 %v384_v11, %v179_v13 }
  0x43   : > { %184 = vst [vmem:[%s165_s18] sm:$0xff] %v182_v14 }
  0x44   : > { %185 = vst [vmem:[%s165_s18 + $0x8] sm:$0xff] %v183_v15 }
  0x45   : > { %426 = shalt.err (!%p423_p6)
}
  0x46   : > { %s427_s5 = scalar_lea.hbm %s203_s29, 256  ;;  %s431_s15 = scalar_lea.hbm %s649_s1, 512 }
  0x47   : > { %p428_p7 = scmp.ne.s32.totalorder %s203_s29, %s427_s5  ;;  %p432_p13 = scmp.lt.s32.totalorder %s203_s29, %s649_s1 }
  0x48   : > { %p433_p2 = scmp.lt.s32.totalorder %s431_s15, %s427_s5 }
  0x49   : > { %p429_p10 = pnand %p428_p7, %p560_p9 }
  0x4a   : > { %p434_p8 = por %p433_p2, %p432_p13 }
  0x4b   : > { %p430_p4 = pneg %p429_p10 }
  0x4d   : > { %p435_p12 = pnand %p434_p8, %p430_p4 }
  0x4f   : > { %438 = shalt.err (!%p435_p12)
}
  0x50   : > { %315 = dma.vmem_to_hbm [thread:$0]  (%p560_p9), %s603_s25, 256, %s203_s29, %s187_s30  }
  0x51 PF: > { %s217_s22 = sand.u32 1, %s473_s6   ;;  %p655_p0 = scmp.ge.s32.totalorder %s493_s11, 2 }
  0x52   : > { %s218_s23 = scalar_lea.sflag [#allocation4], %s217_s22 }
  0x53   : > { %p322_p1 = pnand %p655_p0, %p567_p11 }
  0x55   : > { %p323_p3 = pneg %p322_p1 }
  0x57   : > { %468 = dma.done.wait (%p323_p3), %s218_s23, 256  }
  0x58   : > { %470 = vsyncadd (%p323_p3), %s218_s23, 4294967040  ;;  %s17_s11 = sadd.s32 1, %s493_s11   ;;  %s656_s6 = smov %s477_s7 }
  0x59   : > { %p14_p5 = scmp.ge.s32.totalorder %s17_s11, 4   ;;  %s657_s7 = smov %s481_s8 }
  0x5a   : > { %s658_s8 = smov %s565_s20  ;;  %s659_s9 = smov %s489_s10 }
  0x5b   : > { %s660_s10 = smov %s662_s14  ;;  %16 = sbr.rel (!%p14_p5) target bundleno = 6 (0x6), region = 69 }
  0x60   :  { %223 = vsyncpa [#allocation3], 1 }
  0x61   :  { %225 = vsyncpa [#allocation3 + $0x1], 1 }
  0x62   :  { %226 = vsyncpa [#allocation4], 1 }
  0x63   :  { %228 = vsyncpa [#allocation4 + $0x1], 1 }

</bundles_post_ra>
